<compile_context>
chip_gen: v5e
topology: v5e:2x2
jax: 0.10.0
libtpu: 0.0.40
codegen_flags: <defaults>
</compile_context>

<pallas_src>
import functools

import jax
import jax.numpy as jnp
from jax import lax
from jax.experimental import pallas as pl
from jax.experimental.pallas import tpu as pltpu


def _round_up(x, m):
    return (x + m - 1) // m * m


def _trans_conv_kernel(qx_ref, sx_ref, wq_ref, bq_ref, wk_ref, bk_ref,
                       wv_ref, bv_ref, hmask_ref, hmean_ref, out_ref,
                       *, n_nodes):
    x_q = qx_ref[...]                       # [N, C]  f32
    x_s = sx_ref[...]                       # [L, C]  f32

    # Linear projections, lane-dense [*, 128] (columns >= H*D are zero-padded).
    q = jnp.dot(x_q, wq_ref[...], preferred_element_type=jnp.float32) + bq_ref[...]
    k = jnp.dot(x_s, wk_ref[...], preferred_element_type=jnp.float32) + bk_ref[...]
    v = jnp.dot(x_s, wv_ref[...], preferred_element_type=jnp.float32) + bv_ref[...]

    # torch.norm(t, p=2) with no dim == Frobenius norm of the whole tensor.
    # Zero-padded columns do not change the sums. rsqrt runs on the EUP.
    q = q * lax.rsqrt(jnp.sum(q * q))
    k = k * lax.rsqrt(jnp.sum(k * k))

    n_f = jnp.float32(n_nodes)
    hmask = hmask_ref[...]                  # [P, P] block-diagonal head mask

    # Head-batched kvs: one MXU pass k^T @ v; the block-diagonal mask removes
    # cross-head terms (padded rows/cols are already exactly zero).
    kvs = pl.dot(k, v, trans_a=True) * hmask                     # [P, P]

    # Numerator for all heads at once.
    num = jnp.dot(q, kvs, preferred_element_type=jnp.float32) + n_f * v   # [N, P]

    # Per-head normalizer, broadcast back to lane-dense [N, P] by reusing the
    # block mask as an "expand within head" matrix (matmul, no lane slicing).
    ks_sum = jnp.sum(k, axis=0, keepdims=True)                   # [1, P]
    norm = jnp.dot(q * ks_sum, hmask,
                   preferred_element_type=jnp.float32) + n_f      # [N, P]

    weighted = num * pl.reciprocal(norm, approx=False)            # [N, P]

    # Head-mean folded into a matmul against a padded [P, 128] averaging matrix
    # -> lane-dense output slab (sliced back to out_channels in the wrapper).
    out_ref[...] = jnp.dot(weighted, hmean_ref[...],
                           preferred_element_type=jnp.float32)


def trans_conv_layer(query_input, source_input, params, *, num_heads, out_channels):
    """JAX wrapper. params holds PyTorch-layout weights [out,in] and biases [out]."""
    N, C = query_input.shape
    L = source_input.shape[0]
    # The module's `attention_num += N * vs` silently requires N == L.
    assert N == L, "TransConvLayer semantics require query/source row counts to match"

    H, D = num_heads, out_channels
    HD = H * D
    P = max(128, _round_up(HD, 128))     # lane-dense padded head*channel width
    DP = max(128, _round_up(D, 128))     # lane-dense padded output width

    # --- glue: transpose to [C, HD], zero-pad to 128 lanes (zeros keep norms
    # and kvs exact; padded BIAS columns must be zero). ---
    def pad_w(w):
        return jnp.pad(w.T.astype(jnp.float32), ((0, 0), (0, P - HD)))

    def pad_b(b):
        return jnp.pad(b.astype(jnp.float32).reshape(1, HD), ((0, 0), (0, P - HD)))

    wq, wk, wv = pad_w(params["Wq_w"]), pad_w(params["Wk_w"]), pad_w(params["Wv_w"])
    bq, bk, bv = pad_b(params["Wq_b"]), pad_b(params["Wk_b"]), pad_b(params["Wv_b"])

    # Block-diagonal head mask [P, P]: 1 where both indices are < HD and belong
    # to the same head. Reused as the per-head broadcast/expansion matrix.
    ids = jnp.arange(P)
    head_of = jnp.where(ids < HD, ids // D, -1)
    hmask = ((head_of[:, None] == head_of[None, :]) &
             (head_of[:, None] >= 0)).astype(jnp.float32)

    # Head-mean matrix [P, DP]: hmean[h*D + d, d] = 1/H.
    cols = jnp.arange(DP)
    hmean = jnp.where((ids[:, None] < HD) & (cols[None, :] < D) &
                      ((ids[:, None] % D) == cols[None, :]),
                      1.0 / H, 0.0).astype(jnp.float32)

    flops = int(3 * 2 * N * C * P        # q/k/v projections
                + 2 * L * P * P          # kvs
                + 2 * N * P * P          # numerator
                + 2 * N * P * P          # normalizer expansion
                + 2 * N * P * DP)        # head-mean
    bytes_accessed = int(4 * (N * C + L * C + 3 * (C * P + P)
                              + P * P + P * DP + N * DP))
    ce = pl.CostEstimate(flops=flops,
                         transcendentals=int(2 + N * P),
                         bytes_accessed=bytes_accessed)

    kernel = functools.partial(_trans_conv_kernel, n_nodes=N)
    vmem_spec = pl.BlockSpec(memory_space=pltpu.MemorySpace.VMEM)

    out_padded = pl.pallas_call(
        kernel,
        out_shape=jax.ShapeDtypeStruct((N, DP), jnp.float32),
        in_specs=[vmem_spec] * 10,
        out_specs=vmem_spec,
        cost_estimate=ce,
    )(query_input.astype(jnp.float32), source_input.astype(jnp.float32),
      wq, bq, wk, bk, wv, bv, hmask, hmean)

    return out_padded[:, :D]


def _reference(query_input, source_input, params, *, num_heads, out_channels):
    """Pure-JAX reference mirroring the PyTorch code, for a sanity check."""
    H, D = num_heads, out_channels
    q = (query_input @ params["Wq_w"].T + params["Wq_b"]).reshape(-1, H, D)
    k = (source_input @ params["Wk_w"].T + params["Wk_b"]).reshape(-1, H, D)
    v = (source_input @ params["Wv_w"].T + params["Wv_b"]).reshape(-1, H, D)
    q = q / jnp.linalg.norm(q)
    k = k / jnp.linalg.norm(k)
    N = q.shape[0]
    kvs = jnp.einsum('lhm,lhd->hmd', k, v)
    num = jnp.einsum('nhm,hmd->nhd', q, kvs) + N * v
    ks_sum = jnp.einsum('lhm->hm', k)
    normalizer = jnp.einsum('nhm,hm->nh', q, ks_sum)[..., None] + N
    return (num / normalizer).mean(axis=1)


if __name__ == "__main__":
    # Small shapes consistent with the module's forward (graph nodes x channels).
    N_NODES = 8
    IN_CH = 32
    OUT_CH = 16
    NUM_HEADS = 4
    HD = OUT_CH * NUM_HEADS

    key = jax.random.PRNGKey(0)
    k_qx, k_sx, k_wq, k_bq, k_wk, k_bk, k_wv, k_bv = jax.random.split(key, 8)

    query_input = jax.random.normal(k_qx, (N_NODES, IN_CH), dtype=jnp.float32)
    source_input = jax.random.normal(k_sx, (N_NODES, IN_CH), dtype=jnp.float32)

    bound = 1.0 / (IN_CH ** 0.5)   # PyTorch nn.Linear default init range
    params = {
        "Wq_w": jax.random.uniform(k_wq, (HD, IN_CH), jnp.float32, -bound, bound),
        "Wq_b": jax.random.uniform(k_bq, (HD,), jnp.float32, -bound, bound),
        "Wk_w": jax.random.uniform(k_wk, (HD, IN_CH), jnp.float32, -bound, bound),
        "Wk_b": jax.random.uniform(k_bk, (HD,), jnp.float32, -bound, bound),
        "Wv_w": jax.random.uniform(k_wv, (HD, IN_CH), jnp.float32, -bound, bound),
        "Wv_b": jax.random.uniform(k_bv, (HD,), jnp.float32, -bound, bound),
    }

    out = trans_conv_layer(query_input, source_input, params,
                           num_heads=NUM_HEADS, out_channels=OUT_CH)
    out = jax.block_until_ready(out)

    ref = _reference(query_input, source_input, params,
                     num_heads=NUM_HEADS, out_channels=OUT_CH)
    assert out.shape == (N_NODES, OUT_CH)
    assert jnp.allclose(out, ref, atol=1e-4, rtol=1e-4), "mismatch vs reference"

    print("KERNEL_OK")
</pallas_src>

<mosaic_0001>
module attributes {stable_mosaic.version = 11 : i64} {
  func.func @_trans_conv_kernel(%arg0: memref<8x32xf32, #tpu.memory_space<vmem>>, %arg1: memref<8x32xf32, #tpu.memory_space<vmem>>, %arg2: memref<32x128xf32, #tpu.memory_space<vmem>>, %arg3: memref<1x128xf32, #tpu.memory_space<vmem>>, %arg4: memref<32x128xf32, #tpu.memory_space<vmem>>, %arg5: memref<1x128xf32, #tpu.memory_space<vmem>>, %arg6: memref<32x128xf32, #tpu.memory_space<vmem>>, %arg7: memref<1x128xf32, #tpu.memory_space<vmem>>, %arg8: memref<128x128xf32, #tpu.memory_space<vmem>>, %arg9: memref<128x128xf32, #tpu.memory_space<vmem>>, %arg10: memref<8x128xf32, #tpu.memory_space<vmem>>) attributes {dimension_semantics = [], scalar_prefetch = 0 : i64, scratch_operands = 0 : i64, tpu.core_type = #tpu.core_type<tc>} {
    %c0 = arith.constant 0 : index
    %c0_0 = arith.constant 0 : index
    %0 = vector.load %arg0[%c0, %c0_0] : memref<8x32xf32, #tpu.memory_space<vmem>>, vector<8x32xf32>
    %c0_1 = arith.constant 0 : index
    %c0_2 = arith.constant 0 : index
    %1 = vector.load %arg1[%c0_1, %c0_2] : memref<8x32xf32, #tpu.memory_space<vmem>>, vector<8x32xf32>
    %c0_3 = arith.constant 0 : index
    %c0_4 = arith.constant 0 : index
    %2 = vector.load %arg2[%c0_3, %c0_4] : memref<32x128xf32, #tpu.memory_space<vmem>>, vector<32x128xf32>
    %cst = arith.constant dense<0.000000e+00> : vector<8x128xf32>
    %3 = tpu.matmul %0, %2, %cst {dimension_numbers = #tpu.dot_dimension_numbers<[1], [0], [0], [1], [0, 0, 1, 1], [], []>} : vector<8x32xf32>, vector<32x128xf32>, vector<8x128xf32> -> vector<8x128xf32>
    %c0_5 = arith.constant 0 : index
    %c0_6 = arith.constant 0 : index
    %4 = vector.load %arg3[%c0_5, %c0_6] : memref<1x128xf32, #tpu.memory_space<vmem>>, vector<1x128xf32>
    %5 = vector.broadcast %4 : vector<1x128xf32> to vector<8x128xf32>
    %6 = arith.addf %3, %5 : vector<8x128xf32>
    %c0_7 = arith.constant 0 : index
    %c0_8 = arith.constant 0 : index
    %7 = vector.load %arg4[%c0_7, %c0_8] : memref<32x128xf32, #tpu.memory_space<vmem>>, vector<32x128xf32>
    %cst_9 = arith.constant dense<0.000000e+00> : vector<8x128xf32>
    %8 = tpu.matmul %1, %7, %cst_9 {dimension_numbers = #tpu.dot_dimension_numbers<[1], [0], [0], [1], [0, 0, 1, 1], [], []>} : vector<8x32xf32>, vector<32x128xf32>, vector<8x128xf32> -> vector<8x128xf32>
    %c0_10 = arith.constant 0 : index
    %c0_11 = arith.constant 0 : index
    %9 = vector.load %arg5[%c0_10, %c0_11] : memref<1x128xf32, #tpu.memory_space<vmem>>, vector<1x128xf32>
    %10 = vector.broadcast %9 : vector<1x128xf32> to vector<8x128xf32>
    %11 = arith.addf %8, %10 : vector<8x128xf32>
    %c0_12 = arith.constant 0 : index
    %c0_13 = arith.constant 0 : index
    %12 = vector.load %arg6[%c0_12, %c0_13] : memref<32x128xf32, #tpu.memory_space<vmem>>, vector<32x128xf32>
    %cst_14 = arith.constant dense<0.000000e+00> : vector<8x128xf32>
    %13 = tpu.matmul %1, %12, %cst_14 {dimension_numbers = #tpu.dot_dimension_numbers<[1], [0], [0], [1], [0, 0, 1, 1], [], []>} : vector<8x32xf32>, vector<32x128xf32>, vector<8x128xf32> -> vector<8x128xf32>
    %c0_15 = arith.constant 0 : index
    %c0_16 = arith.constant 0 : index
    %14 = vector.load %arg7[%c0_15, %c0_16] : memref<1x128xf32, #tpu.memory_space<vmem>>, vector<1x128xf32>
    %15 = vector.broadcast %14 : vector<1x128xf32> to vector<8x128xf32>
    %16 = arith.addf %13, %15 : vector<8x128xf32>
    %17 = arith.mulf %6, %6 : vector<8x128xf32>
    %18 = vector.shape_cast %17 : vector<8x128xf32> to vector<1x8x128xf32>
    %cst_17 = arith.constant dense<0.000000e+00> : vector<1xf32>
    %19 = vector.multi_reduction <add>, %18, %cst_17 [1, 2] : vector<1x8x128xf32> to vector<1xf32>
    %20 = vector.shape_cast %19 : vector<1xf32> to vector<1x1x1xf32>
    %21 = vector.extract %20[0, 0, 0] : f32 from vector<1x1x1xf32>
    %22 = math.rsqrt %21 : f32
    %23 = vector.broadcast %22 : f32 to vector<8x128xf32>
    %24 = arith.mulf %6, %23 : vector<8x128xf32>
    %25 = arith.mulf %11, %11 : vector<8x128xf32>
    %26 = vector.shape_cast %25 : vector<8x128xf32> to vector<1x8x128xf32>
    %cst_18 = arith.constant dense<0.000000e+00> : vector<1xf32>
    %27 = vector.multi_reduction <add>, %26, %cst_18 [1, 2] : vector<1x8x128xf32> to vector<1xf32>
    %28 = vector.shape_cast %27 : vector<1xf32> to vector<1x1x1xf32>
    %29 = vector.extract %28[0, 0, 0] : f32 from vector<1x1x1xf32>
    %30 = math.rsqrt %29 : f32
    %31 = vector.broadcast %30 : f32 to vector<8x128xf32>
    %32 = arith.mulf %11, %31 : vector<8x128xf32>
    %c0_19 = arith.constant 0 : index
    %c0_20 = arith.constant 0 : index
    %33 = vector.load %arg8[%c0_19, %c0_20] : memref<128x128xf32, #tpu.memory_space<vmem>>, vector<128x128xf32>
    %cst_21 = arith.constant dense<0.000000e+00> : vector<128x128xf32>
    %34 = tpu.matmul %32, %16, %cst_21 {dimension_numbers = #tpu.dot_dimension_numbers<[0], [0], [1], [1], [0, 1, 1, 1], [], []>} : vector<8x128xf32>, vector<8x128xf32>, vector<128x128xf32> -> vector<128x128xf32>
    %35 = arith.mulf %34, %33 : vector<128x128xf32>
    %cst_22 = arith.constant dense<0.000000e+00> : vector<8x128xf32>
    %36 = tpu.matmul %24, %35, %cst_22 {dimension_numbers = #tpu.dot_dimension_numbers<[1], [0], [0], [1], [0, 0, 1, 1], [], []>} : vector<8x128xf32>, vector<128x128xf32>, vector<8x128xf32> -> vector<8x128xf32>
    %cst_23 = arith.constant 8.000000e+00 : f32
    %37 = vector.broadcast %cst_23 : f32 to vector<8x128xf32>
    %38 = arith.mulf %37, %16 : vector<8x128xf32>
    %39 = arith.addf %36, %38 : vector<8x128xf32>
    %cst_24 = arith.constant dense<0.000000e+00> : vector<128xf32>
    %40 = vector.multi_reduction <add>, %32, %cst_24 [0] : vector<8x128xf32> to vector<128xf32>
    %41 = vector.shape_cast %40 : vector<128xf32> to vector<1x128xf32>
    %42 = vector.broadcast %41 : vector<1x128xf32> to vector<8x128xf32>
    %43 = arith.mulf %24, %42 : vector<8x128xf32>
    %cst_25 = arith.constant dense<0.000000e+00> : vector<8x128xf32>
    %44 = tpu.matmul %43, %33, %cst_25 {dimension_numbers = #tpu.dot_dimension_numbers<[1], [0], [0], [1], [0, 0, 1, 1], [], []>} : vector<8x128xf32>, vector<128x128xf32>, vector<8x128xf32> -> vector<8x128xf32>
    %cst_26 = arith.constant 8.000000e+00 : f32
    %45 = vector.broadcast %cst_26 : f32 to vector<8x128xf32>
    %46 = arith.addf %44, %45 : vector<8x128xf32>
    %47 = tpu.reciprocal %46 : vector<8x128xf32> -> vector<8x128xf32>
    %48 = arith.mulf %39, %47 : vector<8x128xf32>
    %c0_27 = arith.constant 0 : index
    %c0_28 = arith.constant 0 : index
    %49 = vector.load %arg9[%c0_27, %c0_28] : memref<128x128xf32, #tpu.memory_space<vmem>>, vector<128x128xf32>
    %cst_29 = arith.constant dense<0.000000e+00> : vector<8x128xf32>
    %50 = tpu.matmul %48, %49, %cst_29 {dimension_numbers = #tpu.dot_dimension_numbers<[1], [0], [0], [1], [0, 0, 1, 1], [], []>} : vector<8x128xf32>, vector<128x128xf32>, vector<8x128xf32> -> vector<8x128xf32>
    %c0_30 = arith.constant 0 : index
    %c0_31 = arith.constant 0 : index
    %51 = vector.load %arg10[%c0_30, %c0_31] : memref<8x128xf32, #tpu.memory_space<vmem>>, vector<8x128xf32>
    tpu.vector_store %arg10[%c0_30, %c0_31], %50 {strides = array<i32>} : memref<8x128xf32, #tpu.memory_space<vmem>>, vector<8x128xf32>,
    return
  }
}

</mosaic_0001>

<bundles_post_ra>
// kernel: tpu_custom_call.1
= control target key start
LH: loop header
LB: loop body
LE: loop exit
PB: predicated region body
PF: predicated region fallthrough
CT: control target
= control target key end

     0   :  { %15 = vsyncpa [#allocation3], 0  ;;  %s1052_s0 = inlined_call_operand.hbm [shape: f32[8,32], index: 0, kind: input, shape index: {}]   ;;  %s1053_s1 = inlined_call_operand.hbm [shape: f32[8,32], index: 1, kind: input, shape index: {}]   ;;  %s1054_s2 = inlined_call_operand.hbm [shape: f32[32,128], index: 2, kind: input, shape index: {}]   ;;  %s1055_s3 = inlined_call_operand.vmem [shape: f32[1,128], index: 3, kind: input, shape index: {}]   ;;  %s1056_s4 = inlined_call_operand.hbm [shape: f32[32,128], index: 4, kind: input, shape index: {}]   ;;  %s1057_s5 = inlined_call_operand.vmem [shape: f32[1,128], index: 5, kind: input, shape index: {}]   ;;  %s1058_s6 = inlined_call_operand.hbm [shape: f32[32,128], index: 6, kind: input, shape index: {}]   ;;  %s1059_s7 = inlined_call_operand.vmem [shape: f32[1,128], index: 7, kind: input, shape index: {}]   ;;  %s1060_s8 = inlined_call_operand.hbm [shape: f32[128,128], index: 8, kind: input, shape index: {}]   ;;  %s1061_s9 = inlined_call_operand.hbm [shape: f32[128,128], index: 9, kind: input, shape index: {}]   ;;  %s1062_s10 = inlined_call_operand.hbm [shape: f32[8,128], index: 10, kind: output, shape index: {}]  }
   0x1   :  { %16 = vsyncpa [#allocation6], 0 }
   0x2   :  { %17 = vsyncpa [#allocation9], 0 }
   0x3   :  { %18 = vsyncpa [#allocation12], 0  ;;  %s36_s15 = sshll.u32 %s1053_s1, 4  ;;  %s37_s15 = int_to_ptr.hbm [resolvable:$true] %s36_s15 }
   0x4   :  { %19 = vsyncpa [#allocation4], 0  ;;  %s831_s16 = smov [#allocation5]   ;;  %s61_s20 = sshll.u32 %s1056_s4, 4  ;;  %s62_s20 = int_to_ptr.hbm [resolvable:$true] %s61_s20 }
   0x5   :  { %s38_s17 = sshll.u32 %s831_s16, 4  ;;  %s832_s21 = smov [#allocation8]   ;;  %s39_s17 = int_to_ptr.vmem [resolvable:$true] %s38_s17 }
   0x6   :  { %41 = dma.hbm_to_vmem [thread:$0]  %s37_s15, 128, %s39_s17, [#allocation6]  }
   0x7   :  { %s63_s22 = sshll.u32 %s832_s21, 4  ;;  %s91_s25 = sshll.u32 %s1060_s8, 4  ;;  %s64_s22 = int_to_ptr.vmem [resolvable:$true] %s63_s22  ;;  %s92_s25 = int_to_ptr.hbm [resolvable:$true] %s91_s25 }
   0x8   :  { %s833_s1 = smov 128   ;;  %s834_s26 = smov 8  }
   0x9   :  { %69 = dma.hbm_to_vmem [thread:$0]  %s62_s20, 512, %s64_s22, [#allocation9], %s833_s1, %s833_s1, %s834_s26  }
   0xa   :  { %s25_s29 = sshll.u32 %s1052_s0, 4  ;;  %s835_s4 = smov [#allocation11]   ;;  %s26_s29 = int_to_ptr.hbm [resolvable:$true] %s25_s29 }
   0xb   :  { %s93_s30 = sshll.u32 %s835_s4, 4  ;;  %s836_s8 = smov [#allocation2]   ;;  %s94_s30 = int_to_ptr.vmem [resolvable:$true] %s93_s30 }
   0xc   :  { %99 = dma.hbm_to_vmem [thread:$0]  %s92_s25, 2048, %s94_s30, [#allocation12], %s833_s1, %s833_s1, %s834_s26  }
   0xd   :  { %s27_s11 = sshll.u32 %s836_s8, 4  ;;  %s46_s14 = sshll.u32 %s1054_s2, 4  ;;  %s28_s11 = int_to_ptr.vmem [resolvable:$true] %s27_s11  ;;  %s47_s14 = int_to_ptr.hbm [resolvable:$true] %s46_s14 }
   0xe   :  { %30 = dma.hbm_to_vmem [thread:$0]  %s26_s29, 128, %s28_s11, [#allocation3]  }
   0xf   :  { %s76_s0 = sshll.u32 %s1058_s6, 4  ;;  %s837_s17 = smov [#allocation7]   ;;  %s77_s0 = int_to_ptr.hbm [resolvable:$true] %s76_s0 }
  0x10   :  { %s48_s18 = sshll.u32 %s837_s17, 4  ;;  %s838_s19 = smov [#allocation10]   ;;  %s49_s18 = int_to_ptr.vmem [resolvable:$true] %s48_s18 }
  0x11   :  { %54 = dma.hbm_to_vmem [thread:$0]  %s47_s14, 512, %s49_s18, [#allocation6], %s833_s1, %s833_s1, %s834_s26  }
  0x12   :  { %s78_s20 = sshll.u32 %s838_s19, 4  ;;  %s104_s2 = sshll.u32 %s1061_s9, 4  ;;  %s79_s20 = int_to_ptr.vmem [resolvable:$true] %s78_s20  ;;  %s105_s2 = int_to_ptr.hbm [resolvable:$true] %s104_s2 }
  0x13   :  { %84 = dma.hbm_to_vmem [thread:$0]  %s77_s0, 512, %s79_s20, [#allocation9], %s833_s1, %s833_s1, %s834_s26  }
  0x14   :  { %s839_s6 = smov [#allocation13]  }
  0x15   :  { %s106_s23 = sshll.u32 %s839_s6, 4  ;;  %s107_s23 = int_to_ptr.vmem [resolvable:$true] %s106_s23 }
  0x16   :  { %112 = dma.hbm_to_vmem [thread:$0]  %s105_s2, 2048, %s107_s23, [#allocation12], %s833_s1, %s833_s1, %s834_s26  }
  0x17   :  { %821 = dma.done.wait [#allocation3], 128  }
  0x18   :  { %822 = vsyncadd [#allocation3], 4294967168 }
  0x19   :  { %823 = dma.done.wait [#allocation6], 640  }
  0x1a   :  { %824 = vsyncadd [#allocation6], 4294966656 }
  0x1b   :  { %825 = dma.done.wait [#allocation9], 1024  }
  0x1c   :  { %826 = vsyncadd [#allocation9], 4294966272 }
  0x1d   :  { %827 = dma.done.wait [#allocation12], 4096  }
  0x1e   :  { %828 = vsyncadd [#allocation12], 4294963200  ;;  %v146_v0 = vld [vmem:[#allocation7 + $0x18] sm:$0xff]  ;;  %v145_v1 = vld [vmem:[#allocation7 + $0x10] sm:$0xff]  ;;  %vm151_vm0 = vcmask 261120   ;;  %vm330_vm7 = vcmask 64512  }
  0x1f   :  { %167 = vmatpush.msra.mxu0 %v146_v0  ;;  %v178_v2 = vld [vmem:[#allocation8 + $0x18] sm:$0xff]  ;;  %v144_v3 = vld [vmem:[#allocation7 + $0x8] sm:$0xff]  ;;  %v177_v4 = vld [vmem:[#allocation8 + $0x10] sm:$0xff]  ;;  %s567_s11 = sshll.u32 %s1062_s10, 4  ;;  %s568_s11 = int_to_ptr.hbm [resolvable:$true] %s567_s11 }
  0x20   :  { %198 = vmatpush.msra.mxu1 %v178_v2  ;;  %v176_v5 = vld [vmem:[#allocation8 + $0x8] sm:$0xff]  ;;  %v143_v6 = vld [vmem:[#allocation7] sm:$0xff]  ;;  %v141_v7 = vld [vmem:[#allocation2] sm:$0xff] }
  0x21   :  { %168 = vmatpush.msra.mxu0 %v145_v1  ;;  %v175_v8 = vld [vmem:[#allocation8] sm:$0xff]  ;;  %v932_v9 = vld [vmem:[#allocation5] sm:$0xff]  ;;  %v620_v10 = vld [vmem:[%s1055_s3] ss:$0 sm:$0xff] }
  0x22   :  { %199 = vmatpush.msra.mxu1 %v177_v4  ;;  %v621_v13 = vld [vmem:[%s1057_s5] ss:$0 sm:$0xff]  ;;  %v209_v48 = vld [vmem:[#allocation10 + $0x18] sm:$0xff]  ;;  %v207_v50 = vld [vmem:[#allocation10 + $0x8] sm:$0xff] }
  0x23   :  { %169 = vmatpush.msra.mxu0 %v144_v3  ;;  %v208_v49 = vld [vmem:[#allocation10 + $0x10] sm:$0xff]  ;;  %226 = vmatpush.msra.mxu2 %v209_v48  ;;  %v206_v51 = vld [vmem:[#allocation10] sm:$0xff]  ;;  %v960_v58 = vld [vmem:[#allocation11 + $0x78] sm:$0xff] }
  0x24   :  { %200 = vmatpush.msra.mxu1 %v176_v5  ;;  %v622_v54 = vld [vmem:[%s1059_s7] ss:$0 sm:$0xff]  ;;  %v965_v60 = vld [vmem:[#allocation11 + $0x68] sm:$0xff]  ;;  %v968_v61 = vld [vmem:[#allocation11 + $0x60] sm:$0xff]  ;;  %s840_s7 = smov [#allocation14]  }
  0x25   :  { %170 = vmatpush.msra.mxu0 %v143_v6  ;;  %227 = vmatpush.msra.mxu2 %v208_v49  ;;  %v962_v59 = vld [vmem:[#allocation11 + $0x70] sm:$0xff]  ;;  %v973_v63 = vld [vmem:[#allocation11 + $0x58] sm:$0xff]  ;;  %v978_v1 = vld [vmem:[#allocation11 + $0x48] sm:$0xff]  ;;  %s565_s4 = sshll.u32 %s840_s7, 4  ;;  %s566_s4 = int_to_ptr.vmem [resolvable:$true] %s565_s4 }
  0x26   :  { %580 = vmatmul.msk.f32.vlgmr.msra.gmra.mxu0 %vm151_vm0, %v141_v7  ;;  %201 = vmatpush.msra.mxu1 %v175_v8  ;;  %v975_v0 = vld [vmem:[#allocation11 + $0x50] sm:$0xff]  ;;  %v981_v2 = vld [vmem:[#allocation11 + $0x40] sm:$0xff]  ;;  %v986_v4 = vld [vmem:[#allocation11 + $0x38] sm:$0xff] }
  0x27   :  { %581 = vmatmul.msk.f32.vlgmr.msra.gmra.mxu1 %vm151_vm0, %v932_v9  ;;  %228 = vmatpush.msra.mxu2 %v207_v50  ;;  %v988_v5 = vld [vmem:[#allocation11 + $0x30] sm:$0xff]  ;;  %v991_v6 = vld [vmem:[#allocation11 + $0x28] sm:$0xff]  ;;  %v994_v7 = vld [vmem:[#allocation11 + $0x20] sm:$0xff] }
  0x28   :  { %v537_v48 = vld [vmem:[#allocation13 + $0x70] sm:$0xff] }
  0x29   :  { %229 = vmatpush.msra.mxu2 %v206_v51  ;;  %v536_v51 = vld [vmem:[#allocation13 + $0x68] sm:$0xff] }
  0x2a   :  { %582 = vmatmul.msk.f32.vlgmr.msra.gmra.mxu2 %vm151_vm0, %v932_v9  ;;  %v999_v9 = vld [vmem:[#allocation11 + $0x18] sm:$0xff] }
  0xa3   :  { %v172_v11 = vpop.f32.mrf.mxu0 }
  0xa4   :  { %v940_v12 = vadd.f32 %v620_v10, %v172_v11  ;;  %v203_v14 = vpop.f32.mrf.mxu1  ;;  %v1001_v10 = vld [vmem:[#allocation11 + $0x10] sm:$0xff]  ;;  %v1004_v11 = vld [vmem:[#allocation11 + $0x8] sm:$0xff] }
  0xa5   :  { %v204_v16 = vadd.f32 %v621_v13, %v203_v14  ;;  %v1007_v13 = vld [vmem:[#allocation11] sm:$0xff] }
  0xa6   :  { %v234_v15 = vmul.f32 %v940_v12, %v940_v12 }
  0xa7   :  { %v258_v17 = vmul.f32 %v204_v16, %v204_v16 }
  0xa8   :  { %235 = vadd.xlane.f32.xlu0 %v234_v15 }
  0xad   :  { %v231_v55 = vpop.f32.mrf.mxu2 }
  0xae   :  { %v954_v56 = vadd.f32 %v622_v54, %v231_v55  ;;  %v534_v55 = vld [vmem:[#allocation13 + $0x58] sm:$0xff] }
  0xb0   :  { %259 = vadd.xlane.f32.xlu0 %v258_v17  ;;  %394 = vmatpush.msrb.mxu0 %v954_v56 }
  0xb1   :  { %599 = vmatpush.msrb.mxu1 %v954_v56  ;;  %600 = vmatpush.msra.mxu3 %v954_v56 }
  0xb3   :  { %488 = vmatpush.msra.mxu1 %v960_v58 }
  0xb5   :  { %489 = vmatpush.msra.mxu1 %v962_v59 }
  0xb7   :  { %490 = vmatpush.msra.mxu1 %v965_v60 }
  0xb9   :  { %491 = vmatpush.msra.mxu1 %v968_v61 }
  0xbb   :  { %492 = vmatpush.msra.mxu1 %v973_v63 }
  0xbd   :  { %493 = vmatpush.msra.mxu1 %v975_v0 }
  0xbf   :  { %494 = vmatpush.msra.mxu1 %v978_v1 }
  0xc1   :  { %495 = vmatpush.msra.mxu1 %v981_v2 }
  0xc3   :  { %496 = vmatpush.msra.mxu1 %v986_v4 }
  0xc5   :  { %497 = vmatpush.msra.mxu1 %v988_v5 }
  0xc7   :  { %498 = vmatpush.msra.mxu1 %v991_v6 }
  0xc9   :  { %499 = vmatpush.msra.mxu1 %v994_v7 }
  0xcb   :  { %500 = vmatpush.msra.mxu1 %v999_v9 }
  0xcd   :  { %501 = vmatpush.msra.mxu1 %v1001_v10 }
  0xcf   :  { %502 = vmatpush.msra.mxu1 %v1004_v11 }
  0xd1   :  { %503 = vmatpush.msra.mxu1 %v1007_v13 }
 0x11b   :  { %v236_v18 = vpop.xlane.xlu0 %235 }
 0x11c   :  { %v237_v19 = vrot.slane %v236_v18, 4 }
 0x11e   :  { %v238_v20 = vadd.f32 %v237_v19, %v236_v18 }
 0x120   :  { %v239_v21 = vrot.slane %v238_v20, 2 }
 0x122   :  { %v240_v22 = vadd.f32 %v239_v21, %v238_v20 }
 0x123   :  { %v260_v25 = vpop.xlane.xlu0 %259 }
 0x124   :  { %v241_v23 = vrot.slane %v240_v22, 1  ;;  %v261_v26 = vrot.slane %v260_v25, 4 }
 0x126   :  { %v242_v24 = vadd.f32 %v241_v23, %v240_v22  ;;  %v262_v28 = vadd.f32 %v261_v26, %v260_v25 }
 0x128   :  { %601 = vpush %v242_v24  ;;  %v263_v29 = vrot.slane %v262_v28, 2 }
 0x12a   :  { %v264_v33 = vadd.f32 %v263_v29, %v262_v28 }
 0x12c   :  { %v265_v36 = vrot.slane %v264_v33, 1 }
 0x12e   :  { %v266_v39 = vadd.f32 %v265_v36, %v264_v33 }
 0x159   :  { %s602_s3 = spop %601 }
 0x15a   :  { %v244_v27 = vstv %s602_s3 }
 0x15b   :  { %623 = vrsqrt.f32 %v244_v27  ;;  %vm251_vm2 = vweird.f32 %v244_v27 }
 0x161   :  { %v624_v30 = vpop.eup %623 }
 0x162   :  { %v246_v31 = vmul.f32 %v624_v30, %v244_v27  ;;  %vm252_vm1 = vweird.f32 %v624_v30 }
 0x163   :  { %vm253_vm3 = vmor %vm251_vm2, %vm252_vm1 }
 0x164   :  { %v247_v32 = vmul.f32 %v624_v30, %v246_v31 }
 0x166   :  { %v248_v34 = vmul.f32 0.5, %v247_v32 }
 0x168   :  { %v249_v35 = vsub.f32 1.5, %v248_v34 }
 0x16a   :  { %v250_v37 = vmul.f32 %v624_v30, %v249_v35 }
 0x16c   :  { %v254_v38 = vsel %vm253_vm3, %v624_v30, %v250_v37 }
 0x16d   :  { %603 = vpush %v254_v38 }
 0x16e   :  { %605 = vpush %v266_v39 }
 0x19e   :  { %s947_s5 = spop %603 }
 0x19f   :  { %s606_s26 = spop %605  ;;  %v256_v23 = vstv %s947_s5 }
 0x1a0   :  { %v268_v40 = vstv %s606_s26  ;;  %v1017_v25 = vmul.f32 %v256_v23, %v940_v12 }
 0x1a1   :  { %625 = vrsqrt.f32 %v268_v40  ;;  %vm275_vm5 = vweird.f32 %v268_v40 }
 0x1a7   :  { %v626_v41 = vpop.eup %625 }
 0x1a8   :  { %v270_v42 = vmul.f32 %v626_v41, %v268_v40  ;;  %vm276_vm4 = vweird.f32 %v626_v41 }
 0x1a9   :  { %vm277_vm6 = vmor %vm275_vm5, %vm276_vm4 }
 0x1aa   :  { %v271_v43 = vmul.f32 %v626_v41, %v270_v42 }
 0x1ac   :  { %v272_v44 = vmul.f32 0.5, %v271_v43 }
 0x1ae   :  { %v273_v45 = vsub.f32 1.5, %v272_v44 }
 0x1b0   :  { %v274_v46 = vmul.f32 %v626_v41, %v273_v45 }
 0x1b2   :  { %v278_v47 = vsel %vm277_vm6, %v626_v41, %v274_v46 }
 0x1b3   :  { %607 = vpush %v278_v47  ;;  %v538_v47 = vld [vmem:[#allocation13 + $0x78] sm:$0xff] }
 0x1b4   :  { %539 = vmatpush.msrb.mxu2 %v538_v47 }
 0x1b6   :  { %540 = vmatpush.msrb.mxu2 %v537_v48 }
 0x1b8   :  { %541 = vmatpush.msrb.mxu2 %v536_v51 }
 0x1e4   :  { %s608_s27 = spop %607 }
 0x1e5   :  { %v280_v52 = vstv %s608_s27 }
 0x1e6   :  { %v281_v53 = vmul.f32 %v280_v52, %v204_v16 }
 0x1e8   :  { %298 = vxpose.xlu1.b32.start.end [1/1] (short) %v281_v53, 128  ;;  %v481_v15 = vrot.slane %v281_v53, 4 }
 0x1ea   :  { %v482_v17 = vadd.f32 %v481_v15, %v281_v53  ;;  %v535_v53 = vld [vmem:[#allocation13 + $0x60] sm:$0xff] }
 0x1eb   :  { %542 = vmatpush.msrb.mxu2 %v535_v53 }
 0x1ec   :  { %v483_v18 = vrot.slane %v482_v17, 2 }
 0x1ed   :  { %543 = vmatpush.msrb.mxu2 %v534_v55 }
 0x1ee   :  { %v484_v20 = vadd.f32 %v483_v18, %v482_v17  ;;  %v528_v17 = vld [vmem:[#allocation13 + $0x28] sm:$0xff] }
 0x1f0   :  { %v485_v21 = vrot.slane %v484_v20, 1 }
 0x1f2   :  { %v486_v24 = vadd.f32 %v485_v21, %v484_v20  ;;  %v526_v20 = vld [vmem:[#allocation13 + $0x18] sm:$0xff] }
 0x1f4   :  { %v487_v26 = vmul.f32 %v486_v24, %v1017_v25  ;;  %v523_v24 = vld [vmem:[#allocation13] sm:$0xff] }
 0x28c   :  { %v314_v57 = vpop.trf.xlu1 }
 0x28d   :  { %583 = vmatmul.msk.f32.vlgmr.msrb.gmra.mxu0 %vm330_vm7, %v314_v57 }
 0x294   :  { %v315_v62 = vpop.trf.xlu1 }
 0x295   :  { %584 = vmatmul.msk.f32.gmra.mxu0 %vm330_vm7, %v315_v62 }
 0x29c   :  { %v316_v3 = vpop.trf.xlu1 }
 0x29d   :  { %585 = vmatmul.msk.f32.gmra.mxu0 %vm330_vm7, %v316_v3  ;;  %v532_v3 = vld [vmem:[#allocation13 + $0x48] sm:$0xff] }
 0x2a4   :  { %v317_v8 = vpop.trf.xlu1 }
 0x2a5   :  { %586 = vmatmul.msk.f32.gmra.mxu0 %vm330_vm7, %v317_v8 }
 0x2ac   :  { %v318_v14 = vpop.trf.xlu1 }
 0x2ad   :  { %587 = vmatmul.msk.f32.vlgmr.msrb.gmra.mxu1 %vm330_vm7, %v318_v14 }
 0x2b4   :  { %v319_v16 = vpop.trf.xlu1 }
 0x2b5   :  { %588 = vmatmul.msk.f32.gmra.mxu1 %vm330_vm7, %v319_v16 }
 0x2bc   :  { %v320_v19 = vpop.trf.xlu1 }
 0x2bd   :  { %589 = vmatmul.msk.f32.gmra.mxu1 %vm330_vm7, %v320_v19  ;;  %v527_v19 = vld [vmem:[#allocation13 + $0x20] sm:$0xff] }
 0x2c4   :  { %v321_v22 = vpop.trf.xlu1 }
 0x2c5   :  { %590 = vmatmul.msk.f32.gmra.mxu1 %vm330_vm7, %v321_v22  ;;  %v525_v22 = vld [vmem:[#allocation13 + $0x10] sm:$0xff] }
 0x2cc   :  { %v322_v27 = vpop.trf.xlu1 }
 0x2cd   :  { %591 = vmatmul.msk.f32.vlgmr.msra.gmra.mxu3 %vm330_vm7, %v322_v27  ;;  %504 = vmatmul.f32.vlgmr.msra.gmra.mxu1 %v487_v26 }
 0x2d4   :  { %v323_v28 = vpop.trf.xlu1 }
 0x2d5   :  { %592 = vmatmul.msk.f32.gmra.mxu3 %vm330_vm7, %v323_v28 }
 0x2dc   :  { %v324_v29 = vpop.trf.xlu1 }
 0x2dd   :  { %593 = vmatmul.msk.f32.gmra.mxu3 %vm330_vm7, %v324_v29 }
 0x2e4   :  { %v325_v30 = vpop.trf.xlu1 }
 0x2e5   :  { %594 = vmatmul.msk.f32.gmra.mxu3 %vm330_vm7, %v325_v30 }
 0x2ec   :  { %v326_v31 = vpop.trf.xlu1 }
 0x2ed   :  { %595 = vmatmul.msk.f32.gmra.mxu3 %vm330_vm7, %v326_v31 }
 0x2f4   :  { %v327_v12 = vpop.trf.xlu1 }
 0x2f5   :  { %596 = vmatmul.msk.f32.gmra.mxu3 %vm330_vm7, %v327_v12 }
 0x2fc   :  { %v328_v32 = vpop.trf.xlu1 }
 0x2fd   :  { %597 = vmatmul.msk.f32.gmra.mxu3 %vm330_vm7, %v328_v32 }
 0x304   :  { %v329_v33 = vpop.trf.xlu1 }
 0x305   :  { %598 = vmatmul.msk.f32.gmra.mxu3 %vm330_vm7, %v329_v33 }
 0x30a   :  { %v1028_v41 = vpop.f32.mrf.mxu0 }
 0x312   :  { %v399_v46 = vpop.f32.mrf.mxu0 }
 0x313   :  { %v445_v21 = vmul.f32 %v399_v46, %v1004_v11 }
 0x31a   :  { %v402_v62 = vpop.f32.mrf.mxu0 }
 0x322   :  { %v405_v18 = vpop.f32.mrf.mxu0 }
 0x32a   :  { %v408_v39 = vpop.f32.mrf.mxu1 }
 0x332   :  { %v411_v43 = vpop.f32.mrf.mxu1 }
 0x33a   :  { %v414_v50 = vpop.f32.mrf.mxu1 }
 0x33b   :  { %v450_v16 = vmul.f32 %v414_v50, %v988_v5  ;;  %v446_v5 = vmul.f32 %v402_v62, %v1001_v10 }
 0x342   :  { %v417_v8 = vpop.f32.mrf.mxu1 }
 0x343   :  { %v451_v15 = vmul.f32 %v417_v8, %v986_v4  ;;  %v447_v4 = vmul.f32 %v405_v18, %v999_v9  ;;  %v524_v9 = vld [vmem:[#allocation13 + $0x8] sm:$0xff] }
 0x350   :  { %v420_v34 = vpop.f32.mrf.mxu3 }
 0x351   :  { %v452_v14 = vmul.f32 %v420_v34, %v981_v2  ;;  %v448_v2 = vmul.f32 %v408_v39, %v994_v7  ;;  %v505_v7 = vpop.f32.mrf.mxu1 }
 0x352   :  { %v506_v23 = vadd.f32 8.0, %v505_v7 }
 0x354   :  { %627 = vrcp.f32 %v506_v23  ;;  %vm513_vm9 = vweird.f32 %v506_v23  ;;  %v517_v29 = vand.u32 2147483647, %v506_v23 }
 0x356   :  { %vm518_vm11 = vcmp.eq.f32.partialorder %v517_v29, 8.507059e+37 }
 0x358   :  { %v423_v35 = vpop.f32.mrf.mxu3 }
 0x35a   :  { %v628_v10 = vpop.eup %627 }
 0x35b   :  { %v509_v26 = vmul.f32 %v628_v10, %v506_v23  ;;  %vm514_vm8 = vweird.f32 %v628_v10 }
 0x35c   :  { %vm515_vm10 = vmor %vm513_vm9, %vm514_vm8 }
 0x35d   :  { %v510_v11 = vsub.f32 1.0, %v509_v26 }
 0x35f   :  { %v511_v27 = vmul.f32 %v628_v10, %v510_v11 }
 0x360   :  { %v426_v36 = vpop.f32.mrf.mxu3 }
 0x361   :  { %v512_v28 = vadd.f32 %v628_v10, %v511_v27 }
 0x363   :  { %v516_v30 = vsel %vm515_vm10, %v628_v10, %v512_v28 }
 0x368   :  { %v429_v37 = vpop.f32.mrf.mxu3 }
 0x369   :  { %v455_v57 = vmul.f32 %v429_v37, %v973_v63  ;;  %v530_v63 = vld [vmem:[#allocation13 + $0x38] sm:$0xff] }
 0x370   :  { %v432_v38 = vpop.f32.mrf.mxu3 }
 0x371   :  { %v456_v54 = vmul.f32 %v432_v38, %v968_v61  ;;  %v531_v61 = vld [vmem:[#allocation13 + $0x40] sm:$0xff] }
 0x378   :  { %v435_v40 = vpop.f32.mrf.mxu3 }
 0x379   :  { %v457_v52 = vmul.f32 %v435_v40, %v965_v60  ;;  %v453_v60 = vmul.f32 %v423_v35, %v978_v1  ;;  %v449_v1 = vmul.f32 %v411_v43, %v991_v6  ;;  %v444_v6 = vmul.f32 %v1028_v41, %v1007_v13 }
 0x37a   :  { %v519_v13 = vand.u32 2147483648, %v506_v23 }
 0x37c   :  { %v520_v12 = vor.u32 1.1754944e-38, %v519_v13 }
 0x37e   :  { %v521_v33 = vsel %vm518_vm11, %v520_v12, %v516_v30 }
 0x380   :  { %v438_v42 = vpop.f32.mrf.mxu3 }
 0x381   :  { %v458_v49 = vmul.f32 %v438_v42, %v962_v59  ;;  %v454_v59 = vmul.f32 %v426_v36, %v975_v0  ;;  %v529_v0 = vld [vmem:[#allocation13 + $0x30] sm:$0xff] }
 0x388   :  { %v441_v44 = vpop.f32.mrf.mxu3 }
 0x389   :  { %v459_v45 = vmul.f32 %v441_v44, %v960_v58  ;;  %v533_v58 = vld [vmem:[#allocation13 + $0x50] sm:$0xff] }
 0x38a   :  { %544 = vmatpush.msrb.mxu2 %v533_v58 }
 0x38b   :  { %461 = vmatpush.msra.mxu0 %v459_v45 }
 0x38c   :  { %545 = vmatpush.msrb.mxu2 %v532_v3 }
 0x38d   :  { %462 = vmatpush.msra.mxu0 %v458_v49 }
 0x38e   :  { %546 = vmatpush.msrb.mxu2 %v531_v61 }
 0x38f   :  { %463 = vmatpush.msra.mxu0 %v457_v52 }
 0x390   :  { %547 = vmatpush.msrb.mxu2 %v530_v63 }
 0x391   :  { %464 = vmatpush.msra.mxu0 %v456_v54 }
 0x392   :  { %548 = vmatpush.msrb.mxu2 %v529_v0 }
 0x393   :  { %465 = vmatpush.msra.mxu0 %v455_v57 }
 0x394   :  { %549 = vmatpush.msrb.mxu2 %v528_v17 }
 0x395   :  { %466 = vmatpush.msra.mxu0 %v454_v59 }
 0x396   :  { %550 = vmatpush.msrb.mxu2 %v527_v19 }
 0x397   :  { %467 = vmatpush.msra.mxu0 %v453_v60 }
 0x398   :  { %551 = vmatpush.msrb.mxu2 %v526_v20 }
 0x399   :  { %468 = vmatpush.msra.mxu0 %v452_v14 }
 0x39a   :  { %552 = vmatpush.msrb.mxu2 %v525_v22 }
 0x39b   :  { %469 = vmatpush.msra.mxu0 %v451_v15 }
 0x39c   :  { %553 = vmatpush.msrb.mxu2 %v524_v9 }
 0x39d   :  { %470 = vmatpush.msra.mxu0 %v450_v16 }
 0x39e   :  { %554 = vmatpush.msrb.mxu2 %v523_v24 }
 0x39f   :  { %471 = vmatpush.msra.mxu0 %v449_v1 }
 0x3a1   :  { %472 = vmatpush.msra.mxu0 %v448_v2 }
 0x3a3   :  { %473 = vmatpush.msra.mxu0 %v447_v4 }
 0x3a5   :  { %474 = vmatpush.msra.mxu0 %v446_v5 }
 0x3a7   :  { %475 = vmatpush.msra.mxu0 %v445_v21 }
 0x3a9   :  { %476 = vmatpush.msra.mxu0 %v444_v6 }
 0x3aa   :  { %477 = vmatmul.f32.vlgmr.msra.gmra.mxu0 %v1017_v25  ;;  %v460_v25 = vmul.f32 8.0, %v954_v56 }
 0x427   :  { %v478_v31 = vpop.f32.mrf.mxu0 }
 0x428   :  { %v479_v32 = vadd.f32 %v478_v31, %v460_v25 }
 0x42a   :  { %v522_v34 = vmul.f32 %v521_v33, %v479_v32 }
 0x42c   :  { %555 = vmatmul.f32.vlgmr.msrb.gmra.mxu2 %v522_v34 }
 0x4af   :  { %v556_v35 = vpop.f32.mrf.mxu2 }
 0x4b0   :  { %559 = vst [vmem:[#allocation14] sm:$0xff] %v556_v35 }
 0x4b1   :  { %570 = dma.vmem_to_hbm [thread:$0]  %s566_s4, 128, %s568_s11, [#allocation4]  }
 0x4b2   :  { %829 = dma.done.wait [#allocation4], 128  }
 0x4b3   :  { %830 = vsyncadd [#allocation4], 4294967168 }
 0x4b4   :  { %575 = vsyncpa [#allocation3], 1 }
 0x4b5   :  { %576 = vsyncpa [#allocation6], 1 }
 0x4b6   :  { %577 = vsyncpa [#allocation9], 1 }
 0x4b7   :  { %578 = vsyncpa [#allocation12], 1 }
 0x4b8   :  { %579 = vsyncpa [#allocation4], 1 }

</bundles_post_ra>
